<compile_context>
chip_gen: v7x
topology: tpu7x:2x2x1
jax: 0.10.0
libtpu: 0.0.40
codegen_flags: <defaults>
</compile_context>

<pallas_src>
import jax
import jax.numpy as jnp
from jax.experimental import pallas as pl
from jax.experimental.pallas import tpu as pltpu


def _round_up(x, m):
    return ((x + m - 1) // m) * m


def _pick_tb(b_pad, n, d, k_out, budget_bytes=16 << 20):
    """Graphs per grid step.

    Largest 8-aligned divisor of b_pad whose double-buffered footprint
    (bf16 feats + f32 out, plus the resident W/bias double buffers) fits a
    conservative VMEM budget, capped so the grid keeps >= 2 steps whenever
    b_pad >= 16 (so v7x's two TensorCores / megacore both get work)."""
    fixed = 2 * d * k_out * 2 + 2 * k_out * 4          # W (bf16) + bias (f32), x2 buffers
    per_graph = 2 * n * d * 2 + 2 * k_out * 4          # feats (bf16) + out (f32), x2 buffers
    max_by_budget = max(8, (budget_bytes - fixed) // max(per_graph, 1))
    cap = b_pad if b_pad <= 8 else max(8, b_pad // 2)  # >= 2 grid steps when possible
    cap = min(cap, max_by_budget)
    best = 8                                           # 8 always divides b_pad (it is 8-aligned)
    for tb in range(8, int(cap) + 1, 8):
        if b_pad % tb == 0:
            best = tb
    return best


def attention_pooling(feats, w_i, b_i, w_j, b_j):
    """feats: (B, N, D) padded node features (all-zero rows = padding),
    w_i: (1, D), b_i: (1, 1), w_j: (D, H), b_j: (1, H).  Returns (B, H)."""
    B, N, D = feats.shape
    H = w_j.shape[1]

    k_out = _round_up(H + 2, 128)      # project_j cols + score col + rowsum col, lane-dense
    B_pad = _round_up(B, 8)            # output block rows must be 8-aligned

    # bf16 feats for the MXU (accumulation stays f32); only batch-pad, no D/N pad.
    x = feats.astype(jnp.bfloat16)
    if B_pad != B:
        x = jnp.pad(x, ((0, B_pad - B), (0, 0), (0, 0)))

    # Fused weight matrix:
    #   cols [0:H)  -> project_j
    #   col  H      -> project_i score
    #   col  H+1    -> all-ones over the real feature dims (padding-row detector)
    W = jnp.zeros((D, k_out), jnp.float32)
    W = W.at[:, :H].set(w_j.astype(jnp.float32))
    W = W.at[:, H].set(w_i[0].astype(jnp.float32))
    W = W.at[:, H + 1].set(1.0)
    W = W.astype(jnp.bfloat16)

    # Bias row added to the f32 matmul result (b_j per node, b_i on the score
    # column, 0 on the rowsum column so padded rows stay exactly zero there).
    bias = jnp.zeros((1, k_out), jnp.float32)
    bias = bias.at[0, :H].set(b_j[0].astype(jnp.float32))
    bias = bias.at[0, H].set(b_i[0, 0].astype(jnp.float32))

    tb = _pick_tb(B_pad, N, D, k_out)

    def kernel(feats_ref, w_ref, bias_ref, o_ref):
        tb_, n, d = feats_ref.shape
        ko = w_ref.shape[1]

        # One fused MXU matmul over all tb_*n node rows of this step.
        xb = feats_ref[...].reshape(tb_ * n, d)
        y = jnp.dot(xb, w_ref[...], preferred_element_type=jnp.float32)
        y = (y + bias_ref[...]).reshape(tb_, n, ko)     # biases folded in

        s = y[:, :, H:H + 1]            # project_i scores (+ b_i)
        rowsum = y[:, :, H + 1:H + 2]   # sum of the real feature columns

        # masked_fill(mask, -100000.0) — same semantics as the torch reference.
        s = jnp.where(rowsum == 0.0, -100000.0, s)

        # Softmax over the node axis (dim=1), normalization deferred.
        # TODO(synk): for N in the hundreds, relayout the scores lane-major
        # before these reductions; at small N the sublane path is fine.
        s = s - jnp.max(s, axis=1, keepdims=True)
        e = jnp.exp(s)                                  # (tb_, n, 1) f32
        denom = jnp.sum(e, axis=1)                      # (tb_, 1)

        # einsum('bni,bnj->bj'): pool unnormalized, then one scale per row.
        acc = jnp.sum(e * y, axis=1)                    # (tb_, ko) lane-dense
        o_ref[...] = (acc * pl.reciprocal(denom, approx=True)).astype(o_ref.dtype)

    out_padded = pl.pallas_call(
        kernel,
        out_shape=jax.ShapeDtypeStruct((B_pad, k_out), jnp.float32),
        grid_spec=pltpu.PrefetchScalarGridSpec(
            num_scalar_prefetch=0,
            grid=(B_pad // tb,),
            in_specs=[
                pl.BlockSpec((tb, N, D), lambda b: (b, 0, 0)),   # feats (bf16, unpadded N/D)
                pl.BlockSpec((D, k_out), lambda b: (0, 0)),      # fused W (bf16)
                pl.BlockSpec((1, k_out), lambda b: (0, 0)),      # bias row (f32)
            ],
            out_specs=pl.BlockSpec((tb, k_out), lambda b: (b, 0)),
        ),
        compiler_params=pltpu.CompilerParams(
            dimension_semantics=("parallel",),
            vmem_limit_bytes=32 << 20),
    )(x, W, bias)

    return out_padded[:B, :H]


if __name__ == "__main__":
    key = jax.random.PRNGKey(0)
    node_dim, hid_dim = 16, 32
    D = node_dim + hid_dim          # project_* input dim
    B, N = 2, 8                     # batch of 2 graphs, padded to 8 nodes
    node_sizes = jnp.array([5, 8])  # real node counts per graph

    k1, k2, k3, k4, k5 = jax.random.split(key, 5)

    # simulate split_batch output: padded (B, N, D) features, zero rows = padding
    feats = jax.random.normal(k1, (B, N, D), dtype=jnp.float32)
    valid = jnp.arange(N)[None, :, None] < node_sizes[:, None, None]
    feats = jnp.where(valid, feats, 0.0)

    # deterministic "Linear" parameters (project_i: D->1, project_j: D->hid_dim)
    w_i = jax.random.normal(k2, (1, D), dtype=jnp.float32) * 0.1
    b_i = jax.random.normal(k3, (1, 1), dtype=jnp.float32) * 0.1
    w_j = jax.random.normal(k4, (D, hid_dim), dtype=jnp.float32) * 0.1
    b_j = jax.random.normal(k5, (1, hid_dim), dtype=jnp.float32) * 0.1

    out = attention_pooling(feats, w_i, b_i, w_j, b_j)
    out = jax.block_until_ready(out)

    # plain-JAX f32 reference of the PyTorch forward
    s = jnp.einsum('bnd,d->bn', feats, w_i[0]) + b_i[0, 0]
    mask = jnp.sum(feats, axis=-1) == 0.0
    s = jnp.where(mask, -100000.0, s)
    p = jax.nn.softmax(s, axis=1)
    h2 = jnp.einsum('bnd,dh->bnh', feats, w_j) + b_j[0]
    ref = jnp.einsum('bn,bnh->bh', p, h2)

    assert out.shape == (B, hid_dim)
    # bf16 MXU inputs + approximate reciprocal -> compare at bf16-level tolerance.
    assert jnp.allclose(out, ref, atol=2e-2, rtol=2e-2)
    print("KERNEL_OK")
</pallas_src>

<mosaic_0001>
module attributes {stable_mosaic.version = 11 : i64} {
  func.func @kernel(%arg0: i32, %arg1: memref<8x8x48xbf16, #tpu.memory_space<vmem>>, %arg2: memref<48x128xbf16, #tpu.memory_space<vmem>>, %arg3: memref<1x128xf32, #tpu.memory_space<vmem>>, %arg4: memref<8x128xf32, #tpu.memory_space<vmem>>) attributes {dimension_semantics = [#tpu.dimension_semantics<parallel>], iteration_bounds = array<i64: 1>, scalar_prefetch = 0 : i64, scratch_operands = 0 : i64, tpu.core_type = #tpu.core_type<tc>, window_params = [{transform_indices = @transform_0, window_bounds = array<i64: 8, 8, 48>}, {pipeline_mode = #tpu.pipeline_mode<synchronous>, transform_indices = @transform_1, window_bounds = array<i64: 48, 128>}, {pipeline_mode = #tpu.pipeline_mode<synchronous>, transform_indices = @transform_2, window_bounds = array<i64: 1, 128>}, {transform_indices = @transform_3, window_bounds = array<i64: 8, 128>}]} {
    %c0 = arith.constant 0 : index
    %c0_0 = arith.constant 0 : index
    %c0_1 = arith.constant 0 : index
    %0 = vector.load %arg1[%c0, %c0_0, %c0_1] : memref<8x8x48xbf16, #tpu.memory_space<vmem>>, vector<8x8x48xbf16>
    %1 = vector.shape_cast %0 : vector<8x8x48xbf16> to vector<64x48xbf16>
    %c0_2 = arith.constant 0 : index
    %c0_3 = arith.constant 0 : index
    %2 = vector.load %arg2[%c0_2, %c0_3] : memref<48x128xbf16, #tpu.memory_space<vmem>>, vector<48x128xbf16>
    %cst = arith.constant dense<0.000000e+00> : vector<64x128xf32>
    %3 = tpu.matmul %1, %2, %cst {dimension_numbers = #tpu.dot_dimension_numbers<[1], [0], [0], [1], [0, 0, 1, 1], [], []>} : vector<64x48xbf16>, vector<48x128xbf16>, vector<64x128xf32> -> vector<64x128xf32>
    %c0_4 = arith.constant 0 : index
    %c0_5 = arith.constant 0 : index
    %4 = vector.load %arg3[%c0_4, %c0_5] : memref<1x128xf32, #tpu.memory_space<vmem>>, vector<1x128xf32>
    %5 = vector.broadcast %4 : vector<1x128xf32> to vector<64x128xf32>
    %6 = arith.addf %3, %5 : vector<64x128xf32>
    %7 = vector.shape_cast %6 : vector<64x128xf32> to vector<8x8x128xf32>
    %8 = vector.extract_strided_slice %7 {offsets = [0, 0, 32], sizes = [8, 8, 1], strides = [1, 1, 1]} : vector<8x8x128xf32> to vector<8x8x1xf32>
    %9 = vector.extract_strided_slice %7 {offsets = [0, 0, 33], sizes = [8, 8, 1], strides = [1, 1, 1]} : vector<8x8x128xf32> to vector<8x8x1xf32>
    %cst_6 = arith.constant 0.000000e+00 : f32
    %10 = vector.broadcast %cst_6 : f32 to vector<8x8x1xf32>
    %11 = arith.cmpf oeq, %9, %10 : vector<8x8x1xf32>
    %cst_7 = arith.constant -1.000000e+05 : f32
    %12 = vector.broadcast %cst_7 : f32 to vector<8x8x1xf32>
    %13 = arith.select %11, %12, %8 : vector<8x8x1xi1>, vector<8x8x1xf32>
    %cst_8 = arith.constant dense<0xFF800000> : vector<8x1xf32>
    %14 = vector.multi_reduction <maximumf>, %13, %cst_8 [1] : vector<8x8x1xf32> to vector<8x1xf32>
    %15 = vector.shape_cast %14 : vector<8x1xf32> to vector<8x1x1xf32>
    %16 = vector.broadcast %15 : vector<8x1x1xf32> to vector<8x8x1xf32>
    %17 = arith.subf %13, %16 : vector<8x8x1xf32>
    %18 = math.exp %17 : vector<8x8x1xf32>
    %cst_9 = arith.constant dense<0.000000e+00> : vector<8x1xf32>
    %19 = vector.multi_reduction <add>, %18, %cst_9 [1] : vector<8x8x1xf32> to vector<8x1xf32>
    %20 = vector.broadcast %18 : vector<8x8x1xf32> to vector<8x8x128xf32>
    %21 = arith.mulf %20, %7 : vector<8x8x128xf32>
    %cst_10 = arith.constant dense<0.000000e+00> : vector<8x128xf32>
    %22 = vector.multi_reduction <add>, %21, %cst_10 [1] : vector<8x8x128xf32> to vector<8x128xf32>
    %23 = tpu.reciprocal %19 {approx = true} : vector<8x1xf32> -> vector<8x1xf32>
    %24 = vector.broadcast %23 : vector<8x1xf32> to vector<8x128xf32>
    %25 = arith.mulf %22, %24 : vector<8x128xf32>
    %c0_11 = arith.constant 0 : index
    %c0_12 = arith.constant 0 : index
    %26 = vector.load %arg4[%c0_11, %c0_12] : memref<8x128xf32, #tpu.memory_space<vmem>>, vector<8x128xf32>
    tpu.vector_store %arg4[%c0_11, %c0_12], %25 {strides = array<i32>} : memref<8x128xf32, #tpu.memory_space<vmem>>, vector<8x128xf32>,
    return
  }
  func.func @transform_0(%arg0: i32) -> (i32, i32, i32) {
    %c0_i32 = arith.constant 0 : i32
    %c0_i32_0 = arith.constant 0 : i32
    %c0_i32_1 = arith.constant 0 : i32
    return %arg0, %c0_i32, %c0_i32_0 : i32, i32, i32
  }
  func.func @transform_1(%arg0: i32) -> (i32, i32) {
    %c0_i32 = arith.constant 0 : i32
    %c0_i32_0 = arith.constant 0 : i32
    %c0_i32_1 = arith.constant 0 : i32
    return %c0_i32, %c0_i32_0 : i32, i32
  }
  func.func @transform_2(%arg0: i32) -> (i32, i32) {
    %c0_i32 = arith.constant 0 : i32
    %c0_i32_0 = arith.constant 0 : i32
    %c0_i32_1 = arith.constant 0 : i32
    return %c0_i32, %c0_i32_0 : i32, i32
  }
  func.func @transform_3(%arg0: i32) -> (i32, i32) {
    %c0_i32 = arith.constant 0 : i32
    %c0_i32_0 = arith.constant 0 : i32
    return %arg0, %c0_i32 : i32, i32
  }
}

</mosaic_0001>

<bundles_post_ra>
// kernel: tpu_custom_call.1
= control target key start
LH: loop header
LB: loop body
LE: loop exit
PB: predicated region body
PF: predicated region fallthrough
CT: control target
= control target key end

     0   :  { %8 = vsyncpa [#allocation3], 0  ;;  %s853_s0 = inlined_call_operand.hbm [shape: bf16[8,8,48], index: 0, kind: input, shape index: {}]   ;;  %s854_s1 = inlined_call_operand.hbm [shape: bf16[48,128], index: 1, kind: input, shape index: {}]   ;;  %s855_s2 = inlined_call_operand.vmem [shape: f32[1,128], index: 2, kind: input, shape index: {}]   ;;  %s856_s3 = inlined_call_operand.hbm [shape: f32[8,128], index: 3, kind: output, shape index: {}]  }
   0x1   :  { %9 = vsyncpa [#allocation6], 0 }
   0x2   :  { %10 = vsyncpa [#allocation4], 0  ;;  %s717_s12 = smov [#allocation2]   ;;  %s645_s16 = scalar_lea.hbm %s853_s0, 512 }
   0x3   :  { %s16_s13 = sshll.u32 %s717_s12, 4  ;;  %p646_p0 = scmp.ne.s32.totalorder %s853_s0, %s645_s16  ;;  %s17_s13 = int_to_ptr.vmem [resolvable:$true] %s16_s13 }
   0x4   :  { %p649_p1 = scmp.lt.u32.totalorder %s645_s16, %s853_s0 }
   0x6   :  { %p651_p2 = pnand %p649_p1, %p646_p0 }
   0x8   :  { %654 = shalt.err (!%p651_p2)
}
   0x9   :  { %s655_s21 = scalar_lea.vmem %s17_s13, 512  ;;  %p660_p4 = scmp.lt.s32.totalorder %s17_s13, %s17_s13 }
   0xa   :  { %p656_p3 = scmp.ne.s32.totalorder %s17_s13, %s655_s21  ;;  %p661_p5 = scmp.lt.s32.totalorder %s655_s21, %s655_s21 }
   0xc   :  { %p662_p6 = por %p661_p5, %p660_p4 }
   0xe   :  { %p663_p7 = pnand %p662_p6, %p656_p3 }
  0x10   :  { %666 = shalt.err (!%p663_p7)
}
  0x11   :  { %s718_s22 = smov 64   ;;  %s719_s23 = smov 4  }
  0x12   :  { %22 = dma.hbm_to_vmem [thread:$0]  %s853_s0, 512, %s17_s13, [#allocation3], %s718_s22, %s718_s22, %s719_s23  }
  0x13   :  { %s720_s26 = smov [#allocation5]   ;;  %s667_s30 = scalar_lea.hbm %s854_s1, 384 }
  0x14   :  { %s28_s27 = sshll.u32 %s720_s26, 4  ;;  %p668_p8 = scmp.ne.s32.totalorder %s854_s1, %s667_s30  ;;  %s29_s27 = int_to_ptr.vmem [resolvable:$true] %s28_s27 }
  0x15   :  { %p671_p9 = scmp.lt.u32.totalorder %s667_s30, %s854_s1 }
  0x17   :  { %p673_p10 = pnand %p671_p9, %p668_p8 }
  0x19   :  { %676 = shalt.err (!%p673_p10)
}
  0x1a   :  { %s677_s8 = scalar_lea.vmem %s29_s27, 384  ;;  %p682_p12 = scmp.lt.s32.totalorder %s29_s27, %s29_s27 }
  0x1b   :  { %p678_p11 = scmp.ne.s32.totalorder %s29_s27, %s677_s8  ;;  %p683_p13 = scmp.lt.s32.totalorder %s677_s8, %s677_s8 }
  0x1d   :  { %p684_p0 = por %p683_p13, %p682_p12 }
  0x1f   :  { %p685_p1 = pnand %p684_p0, %p678_p11 }
  0x21   :  { %688 = shalt.err (!%p685_p1)
}
  0x22   :  { %34 = dma.hbm_to_vmem [thread:$0]  %s854_s1, 384, %s29_s27, [#allocation6], %s718_s22, %s718_s22, %s719_s23  }
  0x23   :  { %711 = dma.done.wait [#allocation3], 512  }
  0x24   :  { %712 = vsyncadd [#allocation3], 4294966784 }
  0x25   :  { %713 = dma.done.wait [#allocation6], 384  }
  0x26   :  { %714 = vsyncadd [#allocation6], 4294966912  ;;  %v606_v0 = vld [vmem:[#allocation5] sm:$0xff]   ;;  %v607_v1 = vld [vmem:[#allocation5 + $0x8] sm:$0xff]   ;;  %vm103_vm0 = vcmask 392192   ;;  %s721_s11 = smov 1  }
  0x27   :  { %577 = vmatprep.subr.bf16.mxu0 %v606_v0  ;;  %591 = vmatprep.subr.bf16.mxu1 %v606_v0  ;;  %v609_v2 = vld [vmem:[#allocation2] sm:$0xff]   ;;  %v608_v3 = vld [vmem:[#allocation5 + $0x10] sm:$0xff]   ;;  %v610_v5 = vld [vmem:[#allocation2 + $0x8] sm:$0xff]   ;;  %v722_v24 = vmov 33   ;;  %vm229_vm1 = vcmask 277768   ;;  %vm526_vm10 = vcmask 1041409  }
  0x28   :  { %578 = vmatpush3.bf16.msra.mxu0 %v606_v0  ;;  %594 = vmatpush3.bf16.msra.mxu1 %v606_v0  ;;  %v611_v4 = vld [vmem:[#allocation2 + $0x10] sm:$0xff]   ;;  %v612_v6 = vld [vmem:[#allocation2 + $0x18] sm:$0xff]   ;;  %v558_v7 = vld [vmem:[%s855_s2] ss:$0 sm:$0xff]  ;;  %vm528_vm11 = vcmask 1042434   ;;  %vm530_vm12 = vcmask 1043459  }
  0x29   :  { %579 = vmatprep.subr.bf16.mxu0 %v607_v1  ;;  %592 = vmatprep.subr.bf16.mxu1 %v607_v1  ;;  %vm532_vm13 = vcmask 1044484   ;;  %vm534_vm14 = vcmask 1045509   ;;  %vm536_vm15 = vcmask 1046534   ;;  %s723_s2 = smov [#allocation7]  }
  0x2a   :  { %583 = vmatprep.mubr.msk.bf16.mxu0 %vm103_vm0, %v609_v2  ;;  %587 = vmatprep.mubr.msk.bf16.mxu1 %vm103_vm0, %v611_v4  ;;  %s548_s12 = sshll.u32 %s723_s2, 4  ;;  %s549_s12 = int_to_ptr.vmem [resolvable:$true] %s548_s12 }
  0x2b   :  { %604 = vset.pattern.permute.xlu1 %v722_v24  ;;  %605 = vset.pattern.permute.xlu0 %v722_v24  ;;  %s689_s13 = scalar_lea.vmem %s549_s12, 128  ;;  %p694_p3 = scmp.lt.s32.totalorder %s549_s12, %s549_s12 }
  0x2c   :  { %580 = vmatpush3.bf16.msra.mxu0 %v607_v1  ;;  %595 = vmatpush3.bf16.msra.mxu1 %v607_v1  ;;  %p690_p2 = scmp.ne.s32.totalorder %s549_s12, %s689_s13  ;;  %p695_p4 = scmp.lt.s32.totalorder %s689_s13, %s689_s13 }
  0x2d   :  { %581 = vmatprep.subr.bf16.mxu0 %v608_v3  ;;  %593 = vmatprep.subr.bf16.mxu1 %v608_v3 }
  0x2e   :  { %p696_p5 = por %p695_p4, %p694_p3 }
  0x30   :  { %582 = vmatpush3.bf16.msra.mxu0 %v608_v3  ;;  %596 = vmatpush3.bf16.msra.mxu1 %v608_v3  ;;  %p697_p6 = pnand %p696_p5, %p690_p2 }
  0x33   :  { %584 = vmatmul.mubr.msk.bf16.vlgmr.msra.gmra.mrb[0].mxu0 %vm103_vm0, %v610_v5  ;;  %588 = vmatmul.mubr.msk.bf16.vlgmr.msra.gmra.mrb[0].mxu1 %vm103_vm0, %v612_v6  ;;  %vm538_vm0 = vcmask 1047559  }
 0x106   :  { %v585_v8 = vpop.f32.mrb[0].mxu0  ;;  %v589_v9 = vpop.f32.mrb[0].mxu1 }
 0x107   :  { %v775_v10 = vadd.f32 %v585_v8, %v558_v7  ;;  %v150_v11 = vpop.f32.mrb[1].mxu0  ;;  %v166_v12 = vpop.f32.mrb[1].mxu1  ;;  %v795_v23 = vadd.f32 %v589_v9, %v558_v7 }
 0x108   :  { %v777_v13 = vadd.f32 %v558_v7, %v150_v11  ;;  %v586_v14 = vpop.f32.mrb[2].mxu0  ;;  %v590_v15 = vpop.f32.mrb[2].mxu1  ;;  %v788_v21 = vadd.f32 %v558_v7, %v166_v12 }
 0x109   :  { %201 = vrot.lane.b32.xlu1 %v775_v10, %s721_s11  ;;  %v153_v16 = vpop.f32.mrb[3].mxu0  ;;  %v169_v17 = vpop.f32.mrb[3].mxu1  ;;  %v781_v18 = vadd.f32 %v586_v14, %v558_v7  ;;  %v793_v22 = vadd.f32 %v590_v15, %v558_v7  ;;  %vm183_vm2 = vcmp.eq.f32.partialorder %v775_v10, 0.0  ;;  %vm187_vm7 = vcmp.eq.f32.partialorder %v795_v23, 0.0 }
 0x10a   :  { %197 = vrot.lane.b32.xlu0 %v777_v13, %s721_s11  ;;  %v783_v19 = vadd.f32 %v558_v7, %v153_v16  ;;  %v786_v20 = vadd.f32 %v558_v7, %v169_v17  ;;  %vm181_vm3 = vcmp.eq.f32.partialorder %v777_v13, 0.0  ;;  %vm185_vm8 = vcmp.eq.f32.partialorder %v788_v21, 0.0 }
 0x10b   :  { %vm184_vm4 = vcmp.eq.f32.partialorder %v781_v18, 0.0  ;;  %vm188_vm9 = vcmp.eq.f32.partialorder %v793_v22, 0.0 }
 0x10c   :  { %vm182_vm5 = vcmp.eq.f32.partialorder %v783_v19, 0.0  ;;  %vm186_vm6 = vcmp.eq.f32.partialorder %v786_v20, 0.0 }
 0x10d   :  { %203 = vrot.lane.b32.xlu1 %v781_v18, %s721_s11 }
 0x10e   :  { %199 = vrot.lane.b32.xlu0 %v783_v19, %s721_s11 }
 0x111   :  { %207 = vrot.lane.b32.xlu1 %v786_v20, %s721_s11 }
 0x112   :  { %205 = vrot.lane.b32.xlu0 %v788_v21, %s721_s11 }
 0x115   :  { %211 = vrot.lane.b32.xlu1 %v793_v22, %s721_s11 }
 0x116   :  { %209 = vrot.lane.b32.xlu0 %v795_v23, %s721_s11 }
 0x17b   :  { %v202_v25 = vpop.permute.xlu1 %201 }
 0x17c   :  { %v223_v26 = vsel %vm183_vm2, -100000.0, %v202_v25  ;;  %v198_v27 = vpop.permute.xlu0 %197 }
 0x17d   :  { %v244_v28 = vsel %vm229_vm1, %v223_v26, -inf  ;;  %v221_v29 = vsel %vm181_vm3, -100000.0, %v198_v27 }
 0x17e   :  { %v245_v30 = vrot.slane %v244_v28, 4  ;;  %v230_v31 = vsel %vm229_vm1, %v221_v29, -inf }
 0x17f   :  { %v231_v32 = vrot.slane %v230_v31, 4  ;;  %v204_v33 = vpop.permute.xlu1 %203 }
 0x180   :  { %v246_v34 = vmax.f32 %v244_v28, %v245_v30  ;;  %v804_v35 = vsel %vm184_vm4, -100000.0, %v204_v33  ;;  %v200_v36 = vpop.permute.xlu0 %199 }
 0x181   :  { %v232_v37 = vmax.f32 %v230_v31, %v231_v32  ;;  %v251_v38 = vsel %vm229_vm1, %v804_v35, -inf  ;;  %v809_v39 = vsel %vm182_vm5, -100000.0, %v200_v36 }
 0x182   :  { %v247_v40 = vrot.slane %v246_v34, 2  ;;  %v252_v41 = vrot.slane %v251_v38, 4  ;;  %v237_v42 = vsel %vm229_vm1, %v809_v39, -inf }
 0x183   :  { %v233_v43 = vrot.slane %v232_v37, 2  ;;  %v238_v44 = vrot.slane %v237_v42, 4  ;;  %v208_v45 = vpop.permute.xlu1 %207 }
 0x184   :  { %v248_v46 = vmax.f32 %v246_v34, %v247_v40  ;;  %v253_v47 = vmax.f32 %v251_v38, %v252_v41  ;;  %v226_v48 = vsel %vm186_vm6, -100000.0, %v208_v45  ;;  %v206_v49 = vpop.permute.xlu0 %205 }
 0x185   :  { %v234_v50 = vmax.f32 %v232_v37, %v233_v43  ;;  %v239_v51 = vmax.f32 %v237_v42, %v238_v44  ;;  %v265_v52 = vsel %vm229_vm1, %v226_v48, -inf  ;;  %v225_v53 = vsel %vm185_vm8, -100000.0, %v206_v49 }
 0x186   :  { %v249_v54 = vrot.slane %v248_v46, 1  ;;  %v254_v55 = vrot.slane %v253_v47, 2  ;;  %v266_v56 = vrot.slane %v265_v52, 4  ;;  %v258_v57 = vsel %vm229_vm1, %v225_v53, -inf }
 0x187   :  { %v235_v58 = vrot.slane %v234_v50, 1  ;;  %v240_v59 = vrot.slane %v239_v51, 2  ;;  %v259_v60 = vrot.slane %v258_v57, 4  ;;  %v212_v61 = vpop.permute.xlu1 %211 }
 0x188   :  { %v250_v62 = vmax.f32 %v248_v46, %v249_v54  ;;  %v255_v63 = vmax.f32 %v253_v47, %v254_v55  ;;  %v267_v0 = vmax.f32 %v265_v52, %v266_v56  ;;  %v228_v1 = vsel %vm188_vm9, -100000.0, %v212_v61  ;;  %v210_v2 = vpop.permute.xlu0 %209 }
 0x189   :  { %v236_v3 = vmax.f32 %v234_v50, %v235_v58  ;;  %v241_v4 = vmax.f32 %v239_v51, %v240_v59  ;;  %v260_v5 = vmax.f32 %v258_v57, %v259_v60  ;;  %v279_v6 = vsel %vm229_vm1, %v228_v1, -inf }
 0x18a   :  { %v288_v7 = vsub.f32 %v223_v26, %v250_v62  ;;  %v256_v8 = vrot.slane %v255_v63, 1  ;;  %v268_v9 = vrot.slane %v267_v0, 2  ;;  %v280_v11 = vrot.slane %v279_v6, 4 }
 0x18b   :  { %v286_v12 = vsub.f32 %v221_v29, %v236_v3  ;;  %v242_v14 = vrot.slane %v241_v4, 1  ;;  %v261_v15 = vrot.slane %v260_v5, 2  ;;  %v227_v16 = vsel %vm187_vm7, -100000.0, %v210_v2 }
 0x18c   :  { %v298_v17 = vmul.f32 1.442695, %v288_v7  ;;  %v257_v24 = vmax.f32 %v255_v63, %v256_v8  ;;  %v269_v25 = vmax.f32 %v267_v0, %v268_v9  ;;  %v281_v27 = vmax.f32 %v279_v6, %v280_v11 }
 0x18d   :  { %v294_v28 = vmul.f32 1.442695, %v286_v12  ;;  %v243_v30 = vmax.f32 %v241_v4, %v242_v14  ;;  %v262_v31 = vmax.f32 %v260_v5, %v261_v15  ;;  %v272_v32 = vsel %vm229_vm1, %v227_v16, -inf }
 0x18e   :  { %613 = vpow2.f32 %v298_v17  ;;  %v289_v26 = vsub.f32 %v804_v35, %v257_v24  ;;  %v270_v33 = vrot.slane %v269_v25, 1  ;;  %v282_v34 = vrot.slane %v281_v27, 2 }
 0x18f   :  { %615 = vpow2.f32 %v294_v28  ;;  %v287_v29 = vsub.f32 %v809_v39, %v243_v30  ;;  %v263_v36 = vrot.slane %v262_v31, 1  ;;  %v273_v37 = vrot.slane %v272_v32, 4 }
 0x190   :  { %v300_v38 = vmul.f32 1.442695, %v289_v26  ;;  %v271_v40 = vmax.f32 %v269_v25, %v270_v33  ;;  %v283_v41 = vmax.f32 %v281_v27, %v282_v34 }
 0x191   :  { %v296_v42 = vmul.f32 1.442695, %v287_v29  ;;  %v264_v43 = vmax.f32 %v262_v31, %v263_v36  ;;  %v274_v44 = vmax.f32 %v272_v32, %v273_v37 }
 0x192   :  { %617 = vpow2.f32 %v300_v38  ;;  %v291_v45 = vsub.f32 %v226_v48, %v271_v40  ;;  %v284_v46 = vrot.slane %v283_v41, 1 }
 0x193   :  { %619 = vpow2.f32 %v296_v42  ;;  %v290_v47 = vsub.f32 %v225_v53, %v264_v43  ;;  %v275_v49 = vrot.slane %v274_v44, 2 }
 0x194   :  { %v304_v35 = vmul.f32 1.442695, %v291_v45  ;;  %v285_v50 = vmax.f32 %v283_v41, %v284_v46 }
 0x195   :  { %v302_v51 = vmul.f32 1.442695, %v290_v47  ;;  %v276_v52 = vmax.f32 %v274_v44, %v275_v49 }
 0x196   :  { %621 = vpow2.f32 %v304_v35  ;;  %v293_v39 = vsub.f32 %v228_v1, %v285_v50 }
 0x197   :  { %623 = vpow2.f32 %v302_v51  ;;  %v277_v54 = vrot.slane %v276_v52, 1 }
 0x198   :  { %v614_v55 = vpop.eup %613  ;;  %v308_v56 = vmul.f32 1.442695, %v293_v39 }
 0x199   :  { %v616_v57 = vpop.eup %615  ;;  %v324_v58 = vsel %vm229_vm1, %v614_v55, 0.0  ;;  %v278_v59 = vmax.f32 %v276_v52, %v277_v54  ;;  %378 = vperm.xlu1 %604, %v614_v55  }
 0x19a   :  { %v325_v48 = vrot.slane %v324_v58, 4  ;;  %v310_v60 = vsel %vm229_vm1, %v616_v57, 0.0  ;;  %625 = vpow2.f32 %v308_v56  ;;  %368 = vperm.xlu0 %605, %v616_v57  }
 0x19b   :  { %v311_v53 = vrot.slane %v310_v60, 4  ;;  %v292_v61 = vsub.f32 %v227_v16, %v278_v59 }
 0x19c   :  { %v618_v62 = vpop.eup %617  ;;  %v326_v63 = vadd.f32 %v325_v48, %v324_v58 }
 0x19d   :  { %v620_v0 = vpop.eup %619  ;;  %v312_v1 = vadd.f32 %v311_v53, %v310_v60  ;;  %v331_v2 = vsel %vm229_vm1, %v618_v62, 0.0  ;;  %v306_v3 = vmul.f32 1.442695, %v292_v61 }
 0x19e   :  { %v327_v4 = vrot.slane %v326_v63, 2  ;;  %v332_v5 = vrot.slane %v331_v2, 4  ;;  %v317_v6 = vsel %vm229_vm1, %v620_v0, 0.0  ;;  %383 = vperm.xlu0 %605, %v618_v62  }
 0x19f   :  { %v313_v7 = vrot.slane %v312_v1, 2  ;;  %v318_v8 = vrot.slane %v317_v6, 4  ;;  %627 = vpow2.f32 %v306_v3 }
 0x1a0   :  { %v622_v9 = vpop.eup %621  ;;  %v328_v11 = vadd.f32 %v327_v4, %v326_v63  ;;  %v333_v12 = vadd.f32 %v332_v5, %v331_v2 }
 0x1a1   :  { %v624_v14 = vpop.eup %623  ;;  %v314_v15 = vadd.f32 %v313_v7, %v312_v1  ;;  %v319_v16 = vadd.f32 %v318_v8, %v317_v6  ;;  %v345_v17 = vsel %vm229_vm1, %v622_v9, 0.0 }
 0x1a2   :  { %v329_v24 = vrot.slane %v328_v11, 1  ;;  %v334_v25 = vrot.slane %v333_v12, 2  ;;  %v346_v27 = vrot.slane %v345_v17, 4  ;;  %v338_v28 = vsel %vm229_vm1, %v624_v14, 0.0  ;;  %388 = vperm.xlu1 %604, %v624_v14  }
 0x1a3   :  { %v315_v30 = vrot.slane %v314_v15, 1  ;;  %v320_v31 = vrot.slane %v319_v16, 2  ;;  %v339_v32 = vrot.slane %v338_v28, 4 }
 0x1a4   :  { %v626_v26 = vpop.eup %625  ;;  %v330_v33 = vadd.f32 %v329_v24, %v328_v11  ;;  %v335_v34 = vadd.f32 %v334_v25, %v333_v12  ;;  %v347_v29 = vadd.f32 %v346_v27, %v345_v17 }
 0x1a5   :  { %v316_v36 = vadd.f32 %v315_v30, %v314_v15  ;;  %v321_v37 = vadd.f32 %v320_v31, %v319_v16  ;;  %v340_v38 = vadd.f32 %v339_v32, %v338_v28  ;;  %v359_v40 = vsel %vm229_vm1, %v626_v26, 0.0  ;;  %403 = vperm.xlu0 %605, %v626_v26  }
 0x1a6   :  { %629 = vrcp.f32 %v330_v33  ;;  %v336_v41 = vrot.slane %v335_v34, 1  ;;  %v348_v42 = vrot.slane %v347_v29, 2  ;;  %v360_v43 = vrot.slane %v359_v40, 4  ;;  %373 = vperm.xlu1 %604, %v620_v0  }
 0x1a7   :  { %v322_v44 = vrot.slane %v321_v37, 1  ;;  %v341_v45 = vrot.slane %v340_v38, 2  ;;  %631 = vrcp.f32 %v316_v36 }
 0x1a8   :  { %v337_v46 = vadd.f32 %v336_v41, %v335_v34  ;;  %v349_v47 = vadd.f32 %v348_v42, %v347_v29  ;;  %v361_v49 = vadd.f32 %v360_v43, %v359_v40 }
 0x1a9   :  { %v628_v35 = vpop.eup %627  ;;  %v323_v50 = vadd.f32 %v322_v44, %v321_v37  ;;  %v342_v51 = vadd.f32 %v341_v45, %v340_v38  ;;  %393 = vperm.xlu0 %605, %v622_v9  }
 0x1aa   :  { %633 = vrcp.f32 %v337_v46  ;;  %v350_v52 = vrot.slane %v349_v47, 1  ;;  %v362_v39 = vrot.slane %v361_v49, 2  ;;  %v352_v54 = vsel %vm229_vm1, %v628_v35, 0.0  ;;  %398 = vperm.xlu1 %604, %v628_v35  }
 0x1ab   :  { %v343_v55 = vrot.slane %v342_v51, 1  ;;  %v353_v56 = vrot.slane %v352_v54, 4  ;;  %635 = vrcp.f32 %v323_v50 }
 0x1ac   :  { %v363_v57 = vadd.f32 %v362_v39, %v361_v49  ;;  %v351_v48 = vadd.f32 %v350_v52, %v349_v47 }
 0x1ad   :  { %v344_v58 = vadd.f32 %v343_v55, %v342_v51  ;;  %v354_v59 = vadd.f32 %v353_v56, %v352_v54 }
 0x1ae   :  { %v364_v60 = vrot.slane %v363_v57, 1 }
 0x1af   :  { %637 = vrcp.f32 %v344_v58  ;;  %v355_v53 = vrot.slane %v354_v59, 2 }
 0x1b0   :  { %v630_v61 = vpop.eup %629  ;;  %639 = vrcp.f32 %v351_v48  ;;  %v365_v63 = vadd.f32 %v364_v60, %v363_v57 }
 0x1b1   :  { %v356_v62 = vadd.f32 %v355_v53, %v354_v59  ;;  %482 = vperm.xlu1 %604, %v630_v61   ;;  %v632_v0 = vpop.eup %631 }
 0x1b2   :  { %641 = vrcp.f32 %v365_v63 }
 0x1b3   :  { %v357_v1 = vrot.slane %v356_v62, 1 }
 0x1b4   :  { %v634_v2 = vpop.eup %633 }
 0x1b5   :  { %v358_v3 = vadd.f32 %v357_v1, %v356_v62  ;;  %487 = vperm.xlu0 %605, %v634_v2   ;;  %472 = vperm.xlu1 %604, %v632_v0   ;;  %v636_v4 = vpop.eup %635 }
 0x1b7   :  { %643 = vrcp.f32 %v358_v3 }
 0x1b9   :  { %v638_v5 = vpop.eup %637  ;;  %477 = vperm.xlu0 %605, %v636_v4  }
 0x1ba   :  { %492 = vperm.xlu1 %604, %v638_v5   ;;  %v640_v6 = vpop.eup %639 }
 0x1bc   :  { %v642_v7 = vpop.eup %641 }
 0x1bd   :  { %497 = vperm.xlu0 %605, %v640_v6  }
 0x1c1   :  { %v644_v8 = vpop.eup %643  ;;  %507 = vperm.xlu0 %605, %v642_v7  }
 0x1c2   :  { %502 = vperm.xlu1 %604, %v644_v8  }
 0x218   :  { %v379_v11 = vpop.permute.xlu1 %378 }
 0x219   :  { %v369_v9 = vpop.permute.xlu0 %368  ;;  %v408_v15 = vmul.f32 %v379_v11, %v775_v10 }
 0x21a   :  { %v406_v14 = vmul.f32 %v369_v9, %v777_v13 }
 0x21b   :  { %v426_v27 = vrot.slane %v408_v15, 4 }
 0x21c   :  { %v414_v25 = vrot.slane %v406_v14, 4 }
 0x21d   :  { %v384_v12 = vpop.permute.xlu0 %383  ;;  %v427_v29 = vadd.f32 %v426_v27, %v408_v15 }
 0x21e   :  { %v409_v16 = vmul.f32 %v384_v12, %v781_v18  ;;  %v415_v33 = vadd.f32 %v414_v25, %v406_v14 }
 0x21f   :  { %v428_v44 = vrot.slane %v427_v29, 2 }
 0x220   :  { %v432_v30 = vrot.slane %v409_v16, 4  ;;  %v416_v41 = vrot.slane %v415_v33, 2 }
 0x221   :  { %v389_v17 = vpop.permute.xlu1 %388 }
 0x222   :  { %v410_v24 = vmul.f32 %v389_v17, %v788_v21  ;;  %v433_v10 = vadd.f32 %v432_v30, %v409_v16  ;;  %v417_v50 = vadd.f32 %v416_v41, %v415_v33 }
 0x224   :  { %v404_v28 = vpop.permute.xlu0 %403  ;;  %v438_v32 = vrot.slane %v410_v24, 4  ;;  %v434_v46 = vrot.slane %v433_v10, 2 }
 0x225   :  { %v374_v31 = vpop.permute.xlu1 %373  ;;  %v413_v34 = vmul.f32 %v404_v28, %v793_v22 }
 0x226   :  { %v407_v26 = vmul.f32 %v374_v31, %v783_v19  ;;  %v439_v38 = vadd.f32 %v438_v32, %v410_v24  ;;  %v435_v54 = vadd.f32 %v434_v46, %v433_v10 }
 0x227   :  { %v456_v42 = vrot.slane %v413_v34, 4 }
 0x228   :  { %v420_v13 = vrot.slane %v407_v26, 4  ;;  %v394_v36 = vpop.permute.xlu0 %393  ;;  %v440_v22 = vrot.slane %v439_v38, 2  ;;  %v436_v61 = vrot.slane %v435_v54, 1 }
 0x229   :  { %v411_v18 = vmul.f32 %v394_v36, %v786_v20  ;;  %v399_v37 = vpop.permute.xlu1 %398  ;;  %v457_v49 = vadd.f32 %v456_v42, %v413_v34  ;;  %v429_v20 = vadd.f32 %v428_v44, %v427_v29 }
 0x22a   :  { %v421_v21 = vadd.f32 %v420_v13, %v407_v26  ;;  %v412_v40 = vmul.f32 %v399_v37, %v795_v23  ;;  %v441_v55 = vadd.f32 %v440_v22, %v439_v38  ;;  %v418_v23 = vrot.slane %v417_v50, 1 }
 0x22b   :  { %v444_v43 = vrot.slane %v411_v18, 4  ;;  %v458_v56 = vrot.slane %v457_v49, 2  ;;  %v430_v48 = vrot.slane %v429_v20, 1  ;;  %v437_v6 = vadd.f32 %v436_v61, %v435_v54 }
 0x22c   :  { %v422_v45 = vrot.slane %v421_v21, 2  ;;  %v450_v19 = vrot.slane %v412_v40, 4  ;;  %v442_v62 = vrot.slane %v441_v55, 1  ;;  %v419_v63 = vadd.f32 %v418_v23, %v417_v50 }
 0x22d   :  { %v445_v47 = vadd.f32 %v444_v43, %v411_v18  ;;  %v459_v2 = vadd.f32 %v458_v56, %v457_v49  ;;  %v431_v3 = vadd.f32 %v430_v48, %v429_v20 }
 0x22e   :  { %v423_v51 = vadd.f32 %v422_v45, %v421_v21  ;;  %v451_v52 = vadd.f32 %v450_v19, %v412_v40  ;;  %v443_v12 = vadd.f32 %v442_v62, %v441_v55 }
 0x22f   :  { %v446_v35 = vrot.slane %v445_v47, 2  ;;  %v460_v17 = vrot.slane %v459_v2, 1 }
 0x230   :  { %v483_v39 = vpop.permute.xlu1 %482  ;;  %v424_v57 = vrot.slane %v423_v51, 1  ;;  %v452_v59 = vrot.slane %v451_v52, 2 }
 0x231   :  { %v447_v58 = vadd.f32 %v446_v35, %v445_v47  ;;  %v512_v11 = vmul.f32 %v483_v39, %v431_v3  ;;  %v461_v26 = vadd.f32 %v460_v17, %v459_v2 }
 0x232   :  { %v425_v0 = vadd.f32 %v424_v57, %v423_v51  ;;  %v453_v5 = vadd.f32 %v452_v59, %v451_v52 }
 0x233   :  { %v448_v1 = vrot.slane %v447_v58, 1 }
 0x234   :  { %v488_v60 = vpop.permute.xlu0 %487  ;;  %v473_v53 = vpop.permute.xlu1 %472  ;;  %v454_v28 = vrot.slane %v453_v5, 1 }
 0x235   :  { %v510_v7 = vmul.f32 %v473_v53, %v419_v63  ;;  %v513_v14 = vmul.f32 %v488_v60, %v437_v6  ;;  %v449_v16 = vadd.f32 %v448_v1, %v447_v58 }
 0x236   :  { %v455_v33 = vadd.f32 %v454_v28, %v453_v5 }
 0x238   :  { %v478_v4 = vpop.permute.xlu0 %477 }
 0x239   :  { %v511_v8 = vmul.f32 %v478_v4, %v425_v0  ;;  %v493_v9 = vpop.permute.xlu1 %492 }
 0x23a   :  { %v514_v25 = vmul.f32 %v493_v9, %v443_v12 }
 0x23b   :  { %v527_v15 = vsel %vm526_vm10, %v511_v8, %v510_v7 }
 0x23c   :  { %v529_v24 = vsel %vm528_vm11, %v512_v11, %v527_v15  ;;  %v498_v27 = vpop.permute.xlu0 %497 }
 0x23d   :  { %v531_v30 = vsel %vm530_vm12, %v513_v14, %v529_v24  ;;  %v515_v31 = vmul.f32 %v498_v27, %v449_v16 }
 0x23e   :  { %v533_v32 = vsel %vm532_vm13, %v514_v25, %v531_v30 }
 0x23f   :  { %v535_v29 = vsel %vm534_vm14, %v515_v31, %v533_v32 }
 0x240   :  { %v508_v34 = vpop.permute.xlu0 %507 }
 0x241   :  { %v503_v13 = vpop.permute.xlu1 %502  ;;  %v517_v36 = vmul.f32 %v508_v34, %v461_v26 }
 0x242   :  { %v516_v10 = vmul.f32 %v503_v13, %v455_v33 }
 0x244   :  { %v537_v18 = vsel %vm536_vm15, %v516_v10, %v535_v29 }
 0x245   :  { %v539_v37 = vsel %vm538_vm0, %v517_v36, %v537_v18 }
 0x246   :  { %541 = vst [vmem:[#allocation7] sm:$0xff] %v539_v37 }
 0x247   :  { %700 = shalt.err (!%p697_p6)
}
 0x248   :  { %s701_s16 = scalar_lea.hbm %s856_s3, 128 }
 0x249   :  { %p702_p7 = scmp.ne.s32.totalorder %s856_s3, %s701_s16  ;;  %p705_p8 = scmp.lt.u32.totalorder %s701_s16, %s856_s3 }
 0x24b   :  { %p707_p9 = pnand %p705_p8, %p702_p7 }
 0x24d   :  { %710 = shalt.err (!%p707_p9)
}
 0x24e   :  { %551 = dma.vmem_to_hbm [thread:$0]  %s549_s12, 128, %s856_s3, [#allocation4]  }
 0x24f   :  { %715 = dma.done.wait [#allocation4], 128  }
 0x250   :  { %716 = vsyncadd [#allocation4], 4294967168 }
 0x251   :  { %555 = vsyncpa [#allocation3], 1 }
 0x252   :  { %556 = vsyncpa [#allocation6], 1 }
 0x253   :  { %557 = vsyncpa [#allocation4], 1 }

</bundles_post_ra>
